<compile_context>
chip_gen: v7x
topology: tpu7x:2x2x1
jax: 0.10.0
libtpu: 0.0.40
codegen_flags: <defaults>
</compile_context>

<pallas_src>
import math
import functools

import jax
import jax.numpy as jnp
from jax import lax
from jax.experimental import pallas as pl
from jax.experimental.pallas import tpu as pltpu


_INV_SQRT2 = 1.0 / math.sqrt(2.0)


def _round_up(v, m):
    return ((v + m - 1) // m) * m


def _layernorm(v, gamma, beta, eps):
    mu = jnp.mean(v, axis=-1, keepdims=True)
    var = jnp.mean((v - mu) * (v - mu), axis=-1, keepdims=True)
    return (v - mu) * lax.rsqrt(var + eps) * gamma + beta


def _gelu_exact(h):
    # nn.GELU() default (erf form), computed in f32.
    # NOTE: tanh-approx / bf16 GELU could offload to EUP / packed VALU on
    # v6e/v7x if this ever becomes the binding slot; kept exact for fidelity.
    return 0.5 * h * (1.0 + lax.erf(h * _INV_SQRT2))


# ---------------------------------------------------------------------------
# Kernel 1: weight-resident fast path (no reduction axis; W1/W2 DMA'd once).
# ---------------------------------------------------------------------------
def mlp_kernel_resident(x_ref, g_ref, b_ref, w1_ref, b1_ref, w2_ref, b2_ref,
                        o_ref, *, eps):
    x = x_ref[...].astype(jnp.float32)
    gamma = g_ref[...].astype(jnp.float32)
    beta = b_ref[...].astype(jnp.float32)

    # x = self.layernorm(x)
    xn = _layernorm(x, gamma, beta, eps)

    # x = self.fc_1(x); x = self.gelu(x); x = self.dropout(x)  [identity, eval]
    h = jnp.dot(xn.astype(w1_ref.dtype), w1_ref[...],
                preferred_element_type=jnp.float32) + b1_ref[...]
    h = _gelu_exact(h)

    # x = self.fc_2(x); x = x + self.drop_path(x)  [drop_path identity in eval;
    # the resulting 2x is folded into pre-scaled w2/b2 in the wrapper]
    y = jnp.dot(h.astype(w2_ref.dtype), w2_ref[...],
                preferred_element_type=jnp.float32) + b2_ref[...]

    # x = self.layernorm(res + x)
    o_ref[...] = _layernorm(x + y, gamma, beta, eps).astype(o_ref.dtype)


# ---------------------------------------------------------------------------
# Kernel 2: MLP-hidden dim tiled over a k (reduction) grid axis for large H*M.
# ---------------------------------------------------------------------------
def mlp_kernel_tiled(x_ref, g_ref, b_ref, w1_ref, b1_ref, w2_ref, b2_ref,
                     o_ref, xn_ref, acc_ref, *, eps):
    k = pl.program_id(1)

    @pl.when(k == 0)
    def _init():
        x = x_ref[...].astype(jnp.float32)
        gamma = g_ref[...].astype(jnp.float32)
        beta = b_ref[...].astype(jnp.float32)
        # layernorm(x) computed once per row tile, cached in bf16
        xn_ref[...] = _layernorm(x, gamma, beta, eps).astype(xn_ref.dtype)
        acc_ref[...] = jnp.zeros_like(acc_ref)

    # fc_1 partial columns + GELU  (dropout = identity in eval mode)
    h = jnp.dot(xn_ref[...], w1_ref[...],
                preferred_element_type=jnp.float32) + b1_ref[...]
    h = _gelu_exact(h)

    # fc_2 partial reduction over this M tile (w2/b2 pre-scaled by 2)
    acc_ref[...] += jnp.dot(h.astype(w2_ref.dtype), w2_ref[...],
                            preferred_element_type=jnp.float32)

    @pl.when(k == pl.num_programs(1) - 1)
    def _finalize():
        x = x_ref[...].astype(jnp.float32)
        gamma = g_ref[...].astype(jnp.float32)
        beta = b_ref[...].astype(jnp.float32)
        y = acc_ref[...] + b2_ref[...]
        o_ref[...] = _layernorm(x + y, gamma, beta, eps).astype(o_ref.dtype)


# ---------------------------------------------------------------------------
# Configuration helpers
# ---------------------------------------------------------------------------
def _tpu_config():
    """Per-generation VMEM budget, MXU alignment and default tile sizes."""
    kind = ""
    try:
        kind = (getattr(jax.devices()[0], "device_kind", "") or "").lower()
    except Exception:
        pass
    vmem_phys = None
    try:
        vmem_phys = int(pltpu.get_tpu_info().vmem_capacity_bytes)
    except Exception:
        pass

    is_v7 = ("v7" in kind) or ("tpu7" in kind) or (
        vmem_phys is not None and vmem_phys <= (64 << 20))
    is_v5e = ("v5 lite" in kind) or ("v5e" in kind) or ("v5litepod" in kind)

    if is_v7:
        # 64 MiB/TC physical; leave headroom for Mosaic internal scratch.
        cfg = dict(budget=52 << 20, mxu_align=256, def_rows=768, def_m=1024)
    elif is_v5e:
        # 128 MiB VMEM; MXU saturates at modest row tiles -> bigger tile_m.
        cfg = dict(budget=100 << 20, mxu_align=128, def_rows=512, def_m=2048)
    else:
        # v6e & other 128 MiB parts; large row tiles amortize weight streams.
        cfg = dict(budget=100 << 20, mxu_align=256, def_rows=1024, def_m=1024)

    if vmem_phys is not None:
        cfg["budget"] = min(cfg["budget"], int(vmem_phys * 0.8))
    return cfg


def _largest_m_tile(M, tile_m):
    """Largest divisor of M that is a multiple of 128 and <= tile_m."""
    tile_m = min(tile_m, M)
    if M % 128 != 0:
        return M                              # odd hidden size: keep untiled
    best = 128
    d = 128
    while d <= tile_m:
        if M % d == 0:
            best = d
        d += 128
    return best


def _align_rows(tr, mxu_align):
    tr = max(8, tr)
    if tr >= mxu_align:
        return (tr // mxu_align) * mxu_align
    return _round_up(tr, 8)


# ---------------------------------------------------------------------------
# Wrapper
# ---------------------------------------------------------------------------
def mlp_forward(x, gamma, beta, w1, b1, w2, b2, *, eps,
                tile_rows=None, tile_m=None, weights_resident=None,
                training=False):
    """x: (batch, seq, hidden). Returns same shape/dtype."""
    if training:
        # TODO(synk): training-mode dropout / drop_path (pltpu.prng_random_bits)
        raise NotImplementedError("kernel implements eval-mode semantics only")

    B, S, H = x.shape
    M = w1.shape[1]                          # mlp_hidden_size
    rows = B * S
    itemsize = x.dtype.itemsize

    cfg = _tpu_config()
    budget, mxu_align = cfg["budget"], cfg["mxu_align"]
    auto_rows = tile_rows is None
    if tile_rows is None:
        tile_rows = cfg["def_rows"]
    if tile_m is None:
        tile_m = cfg["def_m"]

    # --- row-tile sizing: clamp to problem, align to MXU / sublane layout ---
    tile_rows = _align_rows(min(tile_rows, _round_up(rows, 8)), mxu_align)

    # --- VMEM-footprint models (double-buffered blocks + scratch + headroom
    #     for the tile_rows x tile_m f32 hidden activations) ---
    def fast_bytes(tr):
        return (2 * (H * M + M * H) * 2          # resident W1 + W2 (bf16, 2 bufs)
                + 2 * tr * H * itemsize * 2      # x + out tiles (2 bufs each)
                + 2 * tr * M * 4                 # f32 hidden-activation headroom
                + (M + 4 * H) * 4 * 2)           # biases / gamma / beta

    def tiled_bytes(tr, tm):
        return (2 * tr * H * itemsize * 2        # x + out tiles
                + 2 * (H * tm + tm * H) * 2      # W1 / W2 tiles (bf16, 2 bufs)
                + 2 * tm * 4 * 2 + 3 * H * 4 * 2 # b1 / b2 / gamma / beta
                + tr * H * (2 + 4)               # xn (bf16) + acc (f32) scratch
                + 2 * tr * tm * 4)               # f32 hidden-activation headroom

    # --- path selection: keep weights fully VMEM-resident whenever they fit
    #     (eliminates re-streaming W1/W2 from HBM for every row tile) ---
    if weights_resident is None:
        tr = tile_rows
        while fast_bytes(tr) > budget and tr > 8:
            new_tr = _align_rows(tr // 2, mxu_align)
            if new_tr >= tr:
                break
            tr = new_tr
        if fast_bytes(tr) <= budget:
            weights_resident = True
            tile_rows = tr
        else:
            weights_resident = False

    # --- one-time parameter prep (constants): bf16 weights; fold eval-mode
    #     `x = x + drop_path(x)` doubling into fc_2's weights/bias ---
    w1_b = w1.astype(jnp.bfloat16)                       # (H, M)
    w2_b = (w2 * 2.0).astype(jnp.bfloat16)               # (M, H), 2x folded
    b1_2 = b1.astype(jnp.float32).reshape(1, M)
    b2_2 = (b2 * 2.0).astype(jnp.float32).reshape(1, H)  # 2x folded
    gamma2 = gamma.astype(jnp.float32).reshape(1, H)
    beta2 = beta.astype(jnp.float32).reshape(1, H)

    if weights_resident:
        # Keep >= 2 row tiles when splittable so both v7x TensorCores get work
        # (cheap elsewhere: weights stay resident, extra step ~0.35us).
        if auto_rows and rows <= tile_rows and rows >= 16:
            tile_rows = _align_rows(-(-rows // 2), mxu_align)

        rows_pad = _round_up(rows, tile_rows)
        x2 = x.reshape(rows, H)
        if rows_pad != rows:
            x2 = jnp.pad(x2, ((0, rows_pad - rows), (0, 0)))

        grid = (rows_pad // tile_rows,)
        vmem_limit = min(budget,
                         max(int(fast_bytes(tile_rows) * 1.25) + (2 << 20),
                             16 << 20))

        out = pl.pallas_call(
            functools.partial(mlp_kernel_resident, eps=eps),
            out_shape=jax.ShapeDtypeStruct((rows_pad, H), x.dtype),
            grid_spec=pltpu.PrefetchScalarGridSpec(
                num_scalar_prefetch=0,
                grid=grid,
                in_specs=[
                    pl.BlockSpec((tile_rows, H), lambda i: (i, 0)),  # x rows
                    pl.BlockSpec((1, H), lambda i: (0, 0)),          # gamma
                    pl.BlockSpec((1, H), lambda i: (0, 0)),          # beta
                    pl.BlockSpec((H, M), lambda i: (0, 0)),          # W1 (resident)
                    pl.BlockSpec((1, M), lambda i: (0, 0)),          # b1
                    pl.BlockSpec((M, H), lambda i: (0, 0)),          # W2 (resident)
                    pl.BlockSpec((1, H), lambda i: (0, 0)),          # b2
                ],
                out_specs=pl.BlockSpec((tile_rows, H), lambda i: (i, 0)),
                scratch_shapes=[],
            ),
            compiler_params=pltpu.CompilerParams(
                dimension_semantics=("parallel",),
                vmem_limit_bytes=vmem_limit),
        )(x2, gamma2, beta2, w1_b, b1_2, w2_b, b2_2)
        return out[:rows].reshape(B, S, H)

    # --- tiled-M path: weights too big to keep fully resident ---
    tile_m = _largest_m_tile(M, tile_m)
    while tiled_bytes(tile_rows, tile_m) > budget:
        if tile_m > 128 and M % 128 == 0:
            tile_m = _largest_m_tile(M, max(128, tile_m // 2))
        else:
            new_tr = _align_rows(tile_rows // 2, mxu_align)
            if new_tr >= tile_rows:
                break
            tile_rows = new_tr

    rows_pad = _round_up(rows, tile_rows)
    x2 = x.reshape(rows, H)
    if rows_pad != rows:
        x2 = jnp.pad(x2, ((0, rows_pad - rows), (0, 0)))

    grid = (rows_pad // tile_rows, M // tile_m)
    vmem_limit = min(budget,
                     max(int(tiled_bytes(tile_rows, tile_m) * 1.25) + (2 << 20),
                         16 << 20))

    out = pl.pallas_call(
        functools.partial(mlp_kernel_tiled, eps=eps),
        out_shape=jax.ShapeDtypeStruct((rows_pad, H), x.dtype),
        grid_spec=pltpu.PrefetchScalarGridSpec(
            num_scalar_prefetch=0,
            grid=grid,
            in_specs=[
                pl.BlockSpec((tile_rows, H), lambda i, k: (i, 0)),   # x rows
                pl.BlockSpec((1, H), lambda i, k: (0, 0)),           # gamma
                pl.BlockSpec((1, H), lambda i, k: (0, 0)),           # beta
                pl.BlockSpec((H, tile_m), lambda i, k: (0, k)),      # W1 tile
                pl.BlockSpec((1, tile_m), lambda i, k: (0, k)),      # b1 tile
                pl.BlockSpec((tile_m, H), lambda i, k: (k, 0)),      # W2 tile
                pl.BlockSpec((1, H), lambda i, k: (0, 0)),           # b2
            ],
            out_specs=pl.BlockSpec((tile_rows, H), lambda i, k: (i, 0)),
            scratch_shapes=[
                pltpu.VMEM((tile_rows, H), jnp.bfloat16),   # cached layernorm(x)
                pltpu.VMEM((tile_rows, H), jnp.float32),    # fc_2 accumulator
            ],
        ),
        compiler_params=pltpu.CompilerParams(
            dimension_semantics=("parallel", "arbitrary"),
            vmem_limit_bytes=vmem_limit),
    )(x2, gamma2, beta2, w1_b, b1_2, w2_b, b2_2)

    return out[:rows].reshape(B, S, H)


# ---------------------------------------------------------------------------
# Pure-JAX reference (eval-mode module semantics)
# ---------------------------------------------------------------------------
def reference_forward(x, gamma, beta, w1, b1, w2, b2, *, eps):
    xf = x.astype(jnp.float32)

    def ln(v):
        mu = jnp.mean(v, axis=-1, keepdims=True)
        var = jnp.mean((v - mu) ** 2, axis=-1, keepdims=True)
        return (v - mu) / jnp.sqrt(var + eps) * gamma + beta

    res = xf
    h = ln(xf) @ w1 + b1
    h = 0.5 * h * (1.0 + lax.erf(h / jnp.sqrt(2.0)))
    y = h @ w2 + b2
    y = y + y                      # x + drop_path(x), identity in eval mode
    return ln(res + y).astype(x.dtype)


if __name__ == "__main__":
    # Small, TPU-friendly sizes implied by the module (lane dim = 128)
    batch, seq = 2, 8
    hidden_size = 128
    mlp_hidden_size = 256
    eps = 1e-6

    key = jax.random.PRNGKey(0)
    kx, kw1, kb1, kw2, kb2 = jax.random.split(key, 5)

    x = jax.random.normal(kx, (batch, seq, hidden_size), dtype=jnp.float32)

    # Deterministic parameter init (PyTorch-Linear-like uniform bounds).
    bound1 = 1.0 / math.sqrt(hidden_size)
    bound2 = 1.0 / math.sqrt(mlp_hidden_size)
    w1 = jax.random.uniform(kw1, (hidden_size, mlp_hidden_size), jnp.float32,
                            -bound1, bound1)
    b1 = jax.random.uniform(kb1, (mlp_hidden_size,), jnp.float32, -bound1, bound1)
    w2 = jax.random.uniform(kw2, (mlp_hidden_size, hidden_size), jnp.float32,
                            -bound2, bound2)
    b2 = jax.random.uniform(kb2, (hidden_size,), jnp.float32, -bound2, bound2)
    gamma = jnp.ones((hidden_size,), jnp.float32)
    beta = jnp.zeros((hidden_size,), jnp.float32)

    ref = reference_forward(x, gamma, beta, w1, b1, w2, b2, eps=eps)

    # 1) Auto config: weight-resident fast path (weights fit VMEM at this size).
    out = mlp_forward(x, gamma, beta, w1, b1, w2, b2, eps=eps)
    out = jax.block_until_ready(out)
    assert out.shape == x.shape and out.dtype == x.dtype
    assert jnp.allclose(out, ref, atol=5e-2, rtol=5e-2), "mismatch (fast path)"

    # 2) Force the tiled-M (reduction-axis) path to exercise the accumulator.
    out2 = mlp_forward(x, gamma, beta, w1, b1, w2, b2, eps=eps,
                       weights_resident=False, tile_rows=8, tile_m=128)
    out2 = jax.block_until_ready(out2)
    assert jnp.allclose(out2, ref, atol=5e-2, rtol=5e-2), "mismatch (tiled M)"

    print("KERNEL_OK")
</pallas_src>

<mosaic_0001>
module attributes {stable_mosaic.version = 11 : i64} {
  func.func @mlp_kernel_resident(%arg0: i32, %arg1: memref<8x128xf32, #tpu.memory_space<vmem>>, %arg2: memref<1x128xf32, #tpu.memory_space<vmem>>, %arg3: memref<1x128xf32, #tpu.memory_space<vmem>>, %arg4: memref<128x256xbf16, #tpu.memory_space<vmem>>, %arg5: memref<1x256xf32, #tpu.memory_space<vmem>>, %arg6: memref<256x128xbf16, #tpu.memory_space<vmem>>, %arg7: memref<1x128xf32, #tpu.memory_space<vmem>>, %arg8: memref<8x128xf32, #tpu.memory_space<vmem>>) attributes {dimension_semantics = [#tpu.dimension_semantics<parallel>], iteration_bounds = array<i64: 2>, scalar_prefetch = 0 : i64, scratch_operands = 0 : i64, tpu.core_type = #tpu.core_type<tc>, window_params = [{transform_indices = @transform_0, window_bounds = array<i64: 8, 128>}, {pipeline_mode = #tpu.pipeline_mode<synchronous>, transform_indices = @transform_1, window_bounds = array<i64: 1, 128>}, {pipeline_mode = #tpu.pipeline_mode<synchronous>, transform_indices = @transform_2, window_bounds = array<i64: 1, 128>}, {pipeline_mode = #tpu.pipeline_mode<synchronous>, transform_indices = @transform_3, window_bounds = array<i64: 128, 256>}, {pipeline_mode = #tpu.pipeline_mode<synchronous>, transform_indices = @transform_4, window_bounds = array<i64: 1, 256>}, {pipeline_mode = #tpu.pipeline_mode<synchronous>, transform_indices = @transform_5, window_bounds = array<i64: 256, 128>}, {pipeline_mode = #tpu.pipeline_mode<synchronous>, transform_indices = @transform_6, window_bounds = array<i64: 1, 128>}, {transform_indices = @transform_7, window_bounds = array<i64: 8, 128>}]} {
    %c0 = arith.constant 0 : index
    %c0_0 = arith.constant 0 : index
    %0 = vector.load %arg1[%c0, %c0_0] : memref<8x128xf32, #tpu.memory_space<vmem>>, vector<8x128xf32>
    %c0_1 = arith.constant 0 : index
    %c0_2 = arith.constant 0 : index
    %1 = vector.load %arg2[%c0_1, %c0_2] : memref<1x128xf32, #tpu.memory_space<vmem>>, vector<1x128xf32>
    %c0_3 = arith.constant 0 : index
    %c0_4 = arith.constant 0 : index
    %2 = vector.load %arg3[%c0_3, %c0_4] : memref<1x128xf32, #tpu.memory_space<vmem>>, vector<1x128xf32>
    %cst = arith.constant dense<0.000000e+00> : vector<8xf32>
    %3 = vector.multi_reduction <add>, %0, %cst [1] : vector<8x128xf32> to vector<8xf32>
    %4 = vector.shape_cast %3 : vector<8xf32> to vector<8x1xf32>
    %cst_5 = arith.constant 1.280000e+02 : f32
    %5 = vector.broadcast %cst_5 : f32 to vector<8x1xf32>
    %6 = arith.divf %4, %5 : vector<8x1xf32>
    %7 = vector.broadcast %6 : vector<8x1xf32> to vector<8x128xf32>
    %8 = arith.subf %0, %7 : vector<8x128xf32>
    %9 = vector.broadcast %6 : vector<8x1xf32> to vector<8x128xf32>
    %10 = arith.subf %0, %9 : vector<8x128xf32>
    %11 = arith.mulf %8, %10 : vector<8x128xf32>
    %cst_6 = arith.constant dense<0.000000e+00> : vector<8xf32>
    %12 = vector.multi_reduction <add>, %11, %cst_6 [1] : vector<8x128xf32> to vector<8xf32>
    %13 = vector.shape_cast %12 : vector<8xf32> to vector<8x1xf32>
    %cst_7 = arith.constant 1.280000e+02 : f32
    %14 = vector.broadcast %cst_7 : f32 to vector<8x1xf32>
    %15 = arith.divf %13, %14 : vector<8x1xf32>
    %16 = vector.broadcast %6 : vector<8x1xf32> to vector<8x128xf32>
    %17 = arith.subf %0, %16 : vector<8x128xf32>
    %cst_8 = arith.constant 9.99999997E-7 : f32
    %18 = vector.broadcast %cst_8 : f32 to vector<8x1xf32>
    %19 = arith.addf %15, %18 : vector<8x1xf32>
    %20 = math.rsqrt %19 : vector<8x1xf32>
    %21 = vector.broadcast %20 : vector<8x1xf32> to vector<8x128xf32>
    %22 = arith.mulf %17, %21 : vector<8x128xf32>
    %23 = vector.broadcast %1 : vector<1x128xf32> to vector<8x128xf32>
    %24 = arith.mulf %22, %23 : vector<8x128xf32>
    %25 = vector.broadcast %2 : vector<1x128xf32> to vector<8x128xf32>
    %26 = arith.addf %24, %25 : vector<8x128xf32>
    %27 = arith.truncf %26 : vector<8x128xf32> to vector<8x128xbf16>
    %c0_9 = arith.constant 0 : index
    %c0_10 = arith.constant 0 : index
    %28 = vector.load %arg4[%c0_9, %c0_10] : memref<128x256xbf16, #tpu.memory_space<vmem>>, vector<128x256xbf16>
    %cst_11 = arith.constant dense<0.000000e+00> : vector<8x256xf32>
    %29 = tpu.matmul %27, %28, %cst_11 {dimension_numbers = #tpu.dot_dimension_numbers<[1], [0], [0], [1], [0, 0, 1, 1], [], []>} : vector<8x128xbf16>, vector<128x256xbf16>, vector<8x256xf32> -> vector<8x256xf32>
    %c0_12 = arith.constant 0 : index
    %c0_13 = arith.constant 0 : index
    %30 = vector.load %arg5[%c0_12, %c0_13] : memref<1x256xf32, #tpu.memory_space<vmem>>, vector<1x256xf32>
    %31 = vector.broadcast %30 : vector<1x256xf32> to vector<8x256xf32>
    %32 = arith.addf %29, %31 : vector<8x256xf32>
    %cst_14 = arith.constant 5.000000e-01 : f32
    %33 = vector.broadcast %cst_14 : f32 to vector<8x256xf32>
    %34 = arith.mulf %33, %32 : vector<8x256xf32>
    %cst_15 = arith.constant 0.707106769 : f32
    %35 = vector.broadcast %cst_15 : f32 to vector<8x256xf32>
    %36 = arith.mulf %32, %35 : vector<8x256xf32>
    %37 = math.erf %36 : vector<8x256xf32>
    %cst_16 = arith.constant 1.000000e+00 : f32
    %38 = vector.broadcast %cst_16 : f32 to vector<8x256xf32>
    %39 = arith.addf %38, %37 : vector<8x256xf32>
    %40 = arith.mulf %34, %39 : vector<8x256xf32>
    %41 = arith.truncf %40 : vector<8x256xf32> to vector<8x256xbf16>
    %c0_17 = arith.constant 0 : index
    %c0_18 = arith.constant 0 : index
    %42 = vector.load %arg6[%c0_17, %c0_18] : memref<256x128xbf16, #tpu.memory_space<vmem>>, vector<256x128xbf16>
    %cst_19 = arith.constant dense<0.000000e+00> : vector<8x128xf32>
    %43 = tpu.matmul %41, %42, %cst_19 {dimension_numbers = #tpu.dot_dimension_numbers<[1], [0], [0], [1], [0, 0, 1, 1], [], []>} : vector<8x256xbf16>, vector<256x128xbf16>, vector<8x128xf32> -> vector<8x128xf32>
    %c0_20 = arith.constant 0 : index
    %c0_21 = arith.constant 0 : index
    %44 = vector.load %arg7[%c0_20, %c0_21] : memref<1x128xf32, #tpu.memory_space<vmem>>, vector<1x128xf32>
    %45 = vector.broadcast %44 : vector<1x128xf32> to vector<8x128xf32>
    %46 = arith.addf %43, %45 : vector<8x128xf32>
    %47 = arith.addf %0, %46 : vector<8x128xf32>
    %cst_22 = arith.constant dense<0.000000e+00> : vector<8xf32>
    %48 = vector.multi_reduction <add>, %47, %cst_22 [1] : vector<8x128xf32> to vector<8xf32>
    %49 = vector.shape_cast %48 : vector<8xf32> to vector<8x1xf32>
    %cst_23 = arith.constant 1.280000e+02 : f32
    %50 = vector.broadcast %cst_23 : f32 to vector<8x1xf32>
    %51 = arith.divf %49, %50 : vector<8x1xf32>
    %52 = vector.broadcast %51 : vector<8x1xf32> to vector<8x128xf32>
    %53 = arith.subf %47, %52 : vector<8x128xf32>
    %54 = vector.broadcast %51 : vector<8x1xf32> to vector<8x128xf32>
    %55 = arith.subf %47, %54 : vector<8x128xf32>
    %56 = arith.mulf %53, %55 : vector<8x128xf32>
    %cst_24 = arith.constant dense<0.000000e+00> : vector<8xf32>
    %57 = vector.multi_reduction <add>, %56, %cst_24 [1] : vector<8x128xf32> to vector<8xf32>
    %58 = vector.shape_cast %57 : vector<8xf32> to vector<8x1xf32>
    %cst_25 = arith.constant 1.280000e+02 : f32
    %59 = vector.broadcast %cst_25 : f32 to vector<8x1xf32>
    %60 = arith.divf %58, %59 : vector<8x1xf32>
    %61 = vector.broadcast %51 : vector<8x1xf32> to vector<8x128xf32>
    %62 = arith.subf %47, %61 : vector<8x128xf32>
    %cst_26 = arith.constant 9.99999997E-7 : f32
    %63 = vector.broadcast %cst_26 : f32 to vector<8x1xf32>
    %64 = arith.addf %60, %63 : vector<8x1xf32>
    %65 = math.rsqrt %64 : vector<8x1xf32>
    %66 = vector.broadcast %65 : vector<8x1xf32> to vector<8x128xf32>
    %67 = arith.mulf %62, %66 : vector<8x128xf32>
    %68 = vector.broadcast %1 : vector<1x128xf32> to vector<8x128xf32>
    %69 = arith.mulf %67, %68 : vector<8x128xf32>
    %70 = vector.broadcast %2 : vector<1x128xf32> to vector<8x128xf32>
    %71 = arith.addf %69, %70 : vector<8x128xf32>
    %c0_27 = arith.constant 0 : index
    %c0_28 = arith.constant 0 : index
    %72 = vector.load %arg8[%c0_27, %c0_28] : memref<8x128xf32, #tpu.memory_space<vmem>>, vector<8x128xf32>
    tpu.vector_store %arg8[%c0_27, %c0_28], %71 {strides = array<i32>} : memref<8x128xf32, #tpu.memory_space<vmem>>, vector<8x128xf32>,
    return
  }
  func.func @transform_0(%arg0: i32) -> (i32, i32) {
    %c0_i32 = arith.constant 0 : i32
    %c0_i32_0 = arith.constant 0 : i32
    return %arg0, %c0_i32 : i32, i32
  }
  func.func @transform_1(%arg0: i32) -> (i32, i32) {
    %c0_i32 = arith.constant 0 : i32
    %c0_i32_0 = arith.constant 0 : i32
    %c0_i32_1 = arith.constant 0 : i32
    return %c0_i32, %c0_i32_0 : i32, i32
  }
  func.func @transform_2(%arg0: i32) -> (i32, i32) {
    %c0_i32 = arith.constant 0 : i32
    %c0_i32_0 = arith.constant 0 : i32
    %c0_i32_1 = arith.constant 0 : i32
    return %c0_i32, %c0_i32_0 : i32, i32
  }
  func.func @transform_3(%arg0: i32) -> (i32, i32) {
    %c0_i32 = arith.constant 0 : i32
    %c0_i32_0 = arith.constant 0 : i32
    %c0_i32_1 = arith.constant 0 : i32
    return %c0_i32, %c0_i32_0 : i32, i32
  }
  func.func @transform_4(%arg0: i32) -> (i32, i32) {
    %c0_i32 = arith.constant 0 : i32
    %c0_i32_0 = arith.constant 0 : i32
    %c0_i32_1 = arith.constant 0 : i32
    return %c0_i32, %c0_i32_0 : i32, i32
  }
  func.func @transform_5(%arg0: i32) -> (i32, i32) {
    %c0_i32 = arith.constant 0 : i32
    %c0_i32_0 = arith.constant 0 : i32
    %c0_i32_1 = arith.constant 0 : i32
    return %c0_i32, %c0_i32_0 : i32, i32
  }
  func.func @transform_6(%arg0: i32) -> (i32, i32) {
    %c0_i32 = arith.constant 0 : i32
    %c0_i32_0 = arith.constant 0 : i32
    %c0_i32_1 = arith.constant 0 : i32
    return %c0_i32, %c0_i32_0 : i32, i32
  }
  func.func @transform_7(%arg0: i32) -> (i32, i32) {
    %c0_i32 = arith.constant 0 : i32
    %c0_i32_0 = arith.constant 0 : i32
    return %arg0, %c0_i32 : i32, i32
  }
}

</mosaic_0001>

<bundles_post_ra>
// kernel: tpu_custom_call.1
= control target key start
LH: loop header
LB: loop body
LE: loop exit
PB: predicated region body
PF: predicated region fallthrough
CT: control target
= control target key end

     0   :  { %12 = vsyncpa [#allocation3], 0  ;;  %s1466_s0 = inlined_call_operand.hbm [shape: f32[16,128], index: 0, kind: input, shape index: {}]   ;;  %s1467_s1 = inlined_call_operand.vmem [shape: f32[1,128], index: 1, kind: input, shape index: {}]   ;;  %s1468_s2 = inlined_call_operand.vmem [shape: f32[1,128], index: 2, kind: input, shape index: {}]   ;;  %s1469_s3 = inlined_call_operand.hbm [shape: bf16[128,256], index: 3, kind: input, shape index: {}]   ;;  %s1470_s4 = inlined_call_operand.vmem [shape: f32[1,256], index: 4, kind: input, shape index: {}]   ;;  %s1471_s5 = inlined_call_operand.hbm [shape: bf16[256,128], index: 5, kind: input, shape index: {}]   ;;  %s1472_s6 = inlined_call_operand.vmem [shape: f32[1,128], index: 6, kind: input, shape index: {}]   ;;  %s1473_s7 = inlined_call_operand.hbm [shape: f32[16,128], index: 7, kind: output, shape index: {}]  }
   0x1   :  { %14 = vsyncpa [#allocation3 + $0x1], 0 }
   0x2   :  { %15 = vsyncpa [#allocation6], 0 }
   0x3   :  { %16 = vsyncpa [#allocation4], 0 }
   0x4   :  { %18 = vsyncpa [#allocation4 + $0x1], 0  ;;  %s1208_s24 = smov 0   ;;  %s1210_s25 = smov 0  }
   0x5   :  { %s1212_s26 = smov 0   ;;  %s1214_s27 = smov 0  }
   0x6 LB: > { %s1229_s28 = sadd.s32 4294967295, %s1157_s27   ;;  %s808_s29 = sadd.s32 4294967294, %s1157_s27   ;;  %s1157_s27 = sphi %s1214_s27, %s1493_s27   ;;  %s1153_s26 = sphi %s1212_s26, %s1492_s26   ;;  %s1149_s25 = sphi %s1210_s25, %s1491_s25   ;;  %s1145_s24 = sphi %s1208_s24, %s1490_s24  }
   0x7   : > { %p44_p0 = scmp.ne.s32.totalorder %s1149_s25, %s1145_s24  ;;  %p1474_p1 = scmp.eq.s32.totalorder %s1229_s28, 0 }
   0x8   : > { %p200_p3 = scmp.eq.s32.totalorder %s808_s29, 1  ;;  %p809_p5 = scmp.ge.s32.totalorder %s1157_s27, 1 }
   0x9   : > { %p1238_p4 = por %p1474_p1, %p44_p0  ;;  %p207_p7 = scmp.lt.s32.totalorder %s1157_s27, 3 }
   0xa   : > { %p1243_p6 = por %p200_p3, %p44_p0  ;;  %s1159_s10 = smov [#allocation5]  }
   0xb   : > { %s1477_s30 = scalar_select %p1238_p4, 1, 0 }
   0xc   : > { %s1478_s8 = scalar_select %p1243_p6, 1, 0 }
   0xd   : > { %p1248_p8 = pnand %p809_p5, %p207_p7  ;;  %s225_s11 = sshll.u32 %s1159_s10, 4  ;;  %s1252_s11 = int_to_ptr.vmem [resolvable:$true] %s225_s11 }
   0xe   : > { %s1160_s13 = smov [#allocation7]   ;;  %s1001_s17 = scalar_lea.hbm %s1469_s3, 2048 }
   0xf   : > { %p893_p9 = pneg %p1248_p8  ;;  %s241_s14 = sshll.u32 %s1160_s13, 4  ;;  %s1263_s14 = int_to_ptr.vmem [resolvable:$true] %s241_s14 }
  0x10   : > { %p1002_p12 = scmp.ne.s32.totalorder %s1469_s3, %s1001_s17  ;;  %p1008_p5 = scmp.lt.u32.totalorder %s1001_s17, %s1469_s3 }
  0x11   : > { %p1259_p11 = pnand %p893_p9, %p1474_p1 }
  0x13   : > { %p1003_p13 = pneg %p1259_p11 }
  0x15   : > { %p1004_p0 = pnand %p1003_p13, %p1002_p12 }
  0x17   : > { %p1005_p3 = pneg %p1004_p0 }
  0x19   : > { %p1010_p7 = pnand %p1008_p5, %p1005_p3 }
  0x1b   : > { %1013 = shalt.err (!%p1010_p7)
}
  0x1c   : > { %s1014_s22 = scalar_lea.vmem %s1252_s11, 2048  ;;  %p1022_p2 = scmp.lt.s32.totalorder %s1252_s11, %s1252_s11 }
  0x1d   : > { %p1015_p9 = scmp.ne.s32.totalorder %s1252_s11, %s1014_s22  ;;  %p1023_p12 = scmp.lt.s32.totalorder %s1014_s22, %s1014_s22 }
  0x1f   : > { %p1017_p10 = pnand %p1015_p9, %p1003_p13  ;;  %p1024_p0 = por %p1023_p12, %p1022_p2 }
  0x21   : > { %p1018_p1 = pneg %p1017_p10 }
  0x23   : > { %p1025_p6 = pnand %p1024_p0, %p1018_p1 }
  0x25   : > { %1028 = shalt.err (!%p1025_p6)
}
  0x26   : > { %s1161_s23 = smov 128   ;;  %s1162_s29 = smov 8  }
  0x27   : > { %896 = dma.hbm_to_vmem [thread:$0]  (!%p1259_p11), %s1469_s3, 2048, %s1252_s11, [#allocation6], %s1161_s23, %s1161_s23, %s1162_s29  }
  0x28   : > { %s1029_s17 = scalar_lea.hbm %s1471_s5, 2048 }
  0x29   : > { %p1030_p2 = scmp.ne.s32.totalorder %s1471_s5, %s1029_s17  ;;  %p1036_p10 = scmp.lt.u32.totalorder %s1029_s17, %s1471_s5 }
  0x2b   : > { %p1032_p1 = pnand %p1030_p2, %p1003_p13 }
  0x2d   : > { %p1033_p6 = pneg %p1032_p1 }
  0x2f   : > { %p1038_p3 = pnand %p1036_p10, %p1033_p6 }
  0x31   : > { %1041 = shalt.err (!%p1038_p3)
}
  0x32   : > { %s1042_s11 = scalar_lea.vmem %s1263_s14, 2048  ;;  %p1050_p12 = scmp.lt.s32.totalorder %s1263_s14, %s1263_s14 }
  0x33   : > { %p1043_p5 = scmp.ne.s32.totalorder %s1263_s14, %s1042_s11  ;;  %p1051_p0 = scmp.lt.s32.totalorder %s1042_s11, %s1042_s11 }
  0x35   : > { %p1045_p7 = pnand %p1043_p5, %p1003_p13  ;;  %p1052_p2 = por %p1051_p0, %p1050_p12 }
  0x37   : > { %p1046_p9 = pneg %p1045_p7 }
  0x39   : > { %p1053_p1 = pnand %p1052_p2, %p1046_p9 }
  0x3b   : > { %1056 = shalt.err (!%p1053_p1)
}
  0x3c   : > { %s1163_s22 = smov 64   ;;  %s1164_s23 = smov 4  }
  0x3d   : > { %899 = dma.hbm_to_vmem [thread:$0]  (!%p1259_p11), %s1471_s5, 2048, %s1263_s14, [#allocation6], %s1163_s22, %s1163_s22, %s1164_s23  }
  0x3e   : > { %s1318_s13 = sadd.s32 1, %s1157_s27   ;;  %s31_s16 = sadd.s32 1, %s1153_s26 }
  0x3f   : > { %s28_s15 = ssub.s32 %s1157_s27, %s1318_s13  ;;  %p38_p6 = scmp.ne.s32.totalorder %s1153_s26, %s1149_s25 }
  0x40   : > { %p29_p13 = scmp.eq.s32.totalorder %s28_s15, 0  ;;  %p39_p10 = scmp.eq.s32.totalorder %s1157_s27, 0 }
  0x41   : > { %p1481_p5 = scmp.eq.s32.totalorder %s1229_s28, 1  ;;  %p910_p9 = scmp.lt.s32.totalorder %s1157_s27, 2 }
  0x42   : > { %s1327_s17 = scalar_select %p29_p13, %s1153_s26, %s31_s16  }
  0x43   : > { %p40_p3 = por %p39_p10, %p38_p6  ;;  %p1331_p7 = por %p1481_p5, %p38_p6 }
  0x44   : > { %s258_s12 = sand.u32 1, %s1153_s26   ;;  %s814_s14 = sshll.u32 %s1157_s27, 7 }
  0x45   : > { %s1482_s18 = scalar_select %p1331_p7, 1, 0 }
  0x46   : > { %s813_s19 = sshll.u32 %s258_s12, 3  ;;  %s1341_s11 = scalar_lea.hbm %s1466_s0, %s814_s14 }
  0x47   : > { %s262_s22 = scalar_lea.vmem [#allocation2], %s813_s19  ;;  %p1345_p11 = pnand %p910_p9, %p40_p3 }
  0x48   : > { %s269_s23 = sshll.u32 %s262_s22, 4  ;;  %s259_s10 = scalar_lea.sflag [#allocation3], %s258_s12  ;;  %s1343_s23 = int_to_ptr.vmem [resolvable:$true] %s269_s23 }
  0x49   : > { %s1057_s15 = scalar_lea.hbm %s1341_s11, 128  ;;  %p1059_p0 = pneg %p1345_p11 }
  0x4a   : > { %p1058_p12 = scmp.ne.s32.totalorder %s1341_s11, %s1057_s15  ;;  %s1062_s14 = scalar_lea.hbm %s1466_s0, 256 }
  0x4b   : > { %p1063_p13 = scmp.lt.u32.totalorder %s1341_s11, %s1466_s0  ;;  %p1064_p6 = scmp.lt.u32.totalorder %s1062_s14, %s1057_s15 }
  0x4c   : > { %p1060_p2 = pnand %p1059_p0, %p1058_p12  ;;  %p1066_p3 = scmp.lt.u32.totalorder %s1057_s15, %s1341_s11 }
  0x4d   : > { %p1065_p10 = por %p1064_p6, %p1063_p13 }
  0x4e   : > { %p1061_p1 = pneg %p1060_p2 }
  0x4f   : > { %p1067_p5 = por %p1066_p3, %p1065_p10 }
  0x51   : > { %p1068_p9 = pnand %p1067_p5, %p1061_p1 }
  0x53   : > { %1071 = shalt.err (!%p1068_p9)
}
  0x54   : > { %s1072_s12 = scalar_lea.vmem %s1343_s23, 128  ;;  %s1165_s22 = smov [#allocation2]  }
  0x55   : > { %p1073_p12 = scmp.ne.s32.totalorder %s1343_s23, %s1072_s12  ;;  %s1077_s16 = sshll.u32 %s1165_s22, 4  ;;  %s1078_s16 = int_to_ptr.vmem [resolvable:$false] %s1077_s16 }
  0x56   : > { %s1079_s19 = scalar_lea.vmem %s1078_s16, 256  ;;  %p1080_p4 = scmp.lt.s32.totalorder %s1343_s23, %s1078_s16 }
  0x57   : > { %p1075_p2 = pnand %p1073_p12, %p1059_p0  ;;  %p1081_p13 = scmp.lt.s32.totalorder %s1079_s19, %s1072_s12 }
  0x59   : > { %p1076_p7 = pneg %p1075_p2  ;;  %p1082_p6 = por %p1081_p13, %p1080_p4 }
  0x5b   : > { %p1083_p10 = pnand %p1082_p6, %p1076_p7 }
  0x5d   : > { %1086 = shalt.err (!%p1083_p10)
}
  0x5e   : > { %903 = dma.hbm_to_vmem [thread:$0]  (!%p1345_p11), %s1341_s11, 128, %s1343_s23, %s259_s10  }
  0x5f   : > { %278 = sbr.rel (%p1248_p8) target bundleno = 1199 (0x4af), region = 48  ;;  %s1377_s15 = sand.u32 (!%p1248_p8), 1, %s1149_s25  }
  0x60   : > { %s816_s14 = sshll.u32 (!%p1248_p8), %s1377_s15, 3  ;;  %s281_s20 = scalar_lea.sflag (!%p1248_p8), [#allocation3], %s1377_s15 }
  0x61   : > { %s284_s21 = scalar_lea.vmem (!%p1248_p8), [#allocation2], %s816_s14  ;;  %p1484_p4 = scmp.ne.s32.totalorder (!%p1248_p8), %s1477_s30, 0 }
  0x66   : > { %1132 = dma.done.wait (%p1484_p4), %s281_s20, 128  }
  0x67   : > { %1134 = vsyncadd (%p1484_p4), %s281_s20, 4294967168  ;;  %p1485_p7 = scmp.eq.s32.totalorder %s1229_s28, 0 }
  0x69   : > { %1136 = dma.done.wait (%p1485_p7), [#allocation6], 4096   ;;  %p1486_p8 = pmov %p1485_p7 }
  0x6a   : > { %v1391_v0 = vld [vmem:[%s284_s21] sm:$0xff]  ;;  %v953_v1 = vld [vmem:[#allocation5 + $0x4] ss:$8 sps:$4 sm:$0xff]   ;;  %v955_v2 = vld [vmem:[#allocation5] ss:$8 sps:$4 sm:$0xff]   ;;  %v1166_v16 = vmov 0   ;;  %v372_v48 = vlaneseq }
  0x6b   : > { %1138 = vsyncadd (%p1486_p8), [#allocation6], 4294963200  ;;  %327 = vadd.xlane.f32.xlu0 %v1391_v0  ;;  %v956_v3 = vld [vmem:[#allocation5 + $0x14] ss:$8 sps:$4 sm:$0xff]   ;;  %462 = vmatprep.subr.bf16.mxu0 %v953_v1  ;;  %v958_v4 = vld [vmem:[#allocation5 + $0x10] ss:$8 sps:$4 sm:$0xff]  }
  0x6c   : > { %463 = vmatpush1.bf16.msra.mxu0 %v955_v2  ;;  %v959_v5 = vld [vmem:[#allocation5 + $0x24] ss:$8 sps:$4 sm:$0xff]   ;;  %v961_v10 = vld [vmem:[#allocation5 + $0x20] ss:$8 sps:$4 sm:$0xff]   ;;  %v962_v11 = vld [vmem:[#allocation5 + $0x34] ss:$8 sps:$4 sm:$0xff]   ;;  %494 = vmatprep.mubr.bf16.mxu0 %v1166_v16 }
  0x6d   : > { %464 = vmatprep.subr.bf16.mxu0 %v956_v3  ;;  %v964_v12 = vld [vmem:[#allocation5 + $0x30] ss:$8 sps:$4 sm:$0xff]   ;;  %v965_v13 = vld [vmem:[#allocation5 + $0x44] ss:$8 sps:$4 sm:$0xff]   ;;  %v967_v14 = vld [vmem:[#allocation5 + $0x40] ss:$8 sps:$4 sm:$0xff]  }
  0x6e   : > { %v968_v15 = vld [vmem:[#allocation5 + $0x54] ss:$8 sps:$4 sm:$0xff]   ;;  %v970_v17 = vld [vmem:[#allocation5 + $0x50] ss:$8 sps:$4 sm:$0xff]   ;;  %v971_v18 = vld [vmem:[#allocation5 + $0x64] ss:$8 sps:$4 sm:$0xff]  }
  0x6f   : > { %v973_v19 = vld [vmem:[#allocation5 + $0x60] ss:$8 sps:$4 sm:$0xff]   ;;  %v974_v20 = vld [vmem:[#allocation5 + $0x74] ss:$8 sps:$4 sm:$0xff]   ;;  %v976_v21 = vld [vmem:[#allocation5 + $0x70] ss:$8 sps:$4 sm:$0xff]  }
  0x70   : > { %465 = vmatpush1.bf16.msra.mxu0 %v958_v4  ;;  %v977_v22 = vld [vmem:[#allocation7 + $0x40] sm:$0xff]   ;;  %v979_v24 = vld [vmem:[#allocation7 + $0x48] sm:$0xff]   ;;  %v1398_v30 = vld [vmem:[%s1467_s1] ss:$0 sm:$0xff]  ;;  %v373_v49 = vshrl.u32 %v372_v48, 7  ;;  %s856_s16 = sshll.u32 %s1229_s28, 7 }
  0x71   : > { %466 = vmatprep.subr.bf16.mxu0 %v959_v5  ;;  %v978_v23 = vld [vmem:[#allocation7] sm:$0xff]   ;;  %859 = vmatprep.subr.bf16.mxu1 %v977_v22  ;;  %v980_v25 = vld [vmem:[#allocation7 + $0x8] sm:$0xff]   ;;  %v1403_v32 = vld [vmem:[%s1468_s2] ss:$0 sm:$0xff]  ;;  %s322_s19 = scalar_lea.vmem [#allocation8], %s816_s14  ;;  %s1422_s9 = scalar_lea.hbm %s1473_s7, %s856_s16 }
  0x72   : > { %860 = vmatpush3.bf16.msra.mxu1 %v978_v23  ;;  %v981_v36 = vld [vmem:[#allocation7 + $0x50] sm:$0xff]   ;;  %v983_v38 = vld [vmem:[#allocation7 + $0x58] sm:$0xff]   ;;  %v985_v40 = vld [vmem:[#allocation7 + $0x60] sm:$0xff]   ;;  %v374_v50 = vsub.s32 0, %v373_v49  ;;  %v378_v52 = vsub.s32 1, %v373_v49  ;;  %s719_s20 = sshll.u32 %s322_s19, 4  ;;  %s1424_s20 = int_to_ptr.vmem [resolvable:$true] %s719_s20 }
  0x73   : > { %861 = vmatprep.subr.bf16.mxu1 %v979_v24  ;;  %v982_v37 = vld [vmem:[#allocation7 + $0x10] sm:$0xff]   ;;  %v984_v39 = vld [vmem:[#allocation7 + $0x18] sm:$0xff]   ;;  %v986_v41 = vld [vmem:[#allocation7 + $0x20] sm:$0xff]   ;;  %s706_s11 = scalar_lea.sflag [#allocation4], %s1377_s15  ;;  %s1087_s28 = scalar_lea.vmem %s1424_s20, 128 }
  0x74   : > { %467 = vmatpush1.bf16.msra.mxu0 %v961_v10  ;;  %v987_v42 = vld [vmem:[#allocation7 + $0x68] sm:$0xff]   ;;  %v989_v44 = vld [vmem:[#allocation7 + $0x70] sm:$0xff]   ;;  %v991_v46 = vld [vmem:[#allocation7 + $0x78] sm:$0xff]   ;;  %p1088_p11 = scmp.ne.s32.totalorder %s1424_s20, %s1087_s28  ;;  %p1487_p0 = scmp.ne.s32.totalorder %s1482_s18, 0 }
  0x75   : > { %468 = vmatprep.subr.bf16.mxu0 %v962_v11  ;;  %v988_v43 = vld [vmem:[#allocation7 + $0x28] sm:$0xff]   ;;  %v990_v45 = vld [vmem:[#allocation7 + $0x30] sm:$0xff]   ;;  %v992_v47 = vld [vmem:[#allocation7 + $0x38] sm:$0xff]   ;;  %s1167_s14 = smov [#allocation8]  }
  0x76   : > { %862 = vmatpush3.bf16.msra.mxu1 %v980_v25  ;;  %v370_v51 = vld [vmem:[%s1470_s4] sm:$0x3]  ;;  %p1089_p1 = pnand %p1088_p11, %p1487_p0  ;;  %s1091_s23 = sshll.u32 %s1167_s14, 4  ;;  %s1092_s23 = int_to_ptr.vmem [resolvable:$false] %s1091_s23 }
  0x77   : > { %863 = vmatprep.subr.bf16.mxu1 %v981_v36  ;;  %v375_v53 = vrot.slane %v370_v51, %v374_v50  ;;  %v379_v54 = vrot.slane %v370_v51, %v378_v52  ;;  %v838_v11 = vld [vmem:[%s1472_s6] ss:$0 sm:$0xff]  ;;  %s1093_s29 = scalar_lea.vmem %s1092_s23, 256  ;;  %p1094_p5 = scmp.lt.s32.totalorder %s1424_s20, %s1092_s23 }
  0x78   : > { %469 = vmatpush1.bf16.msra.mxu0 %v964_v12  ;;  %p1090_p3 = pneg %p1089_p1  ;;  %p1095_p9 = scmp.lt.s32.totalorder %s1093_s29, %s1087_s28 }
  0x79   : > { %470 = vmatprep.subr.bf16.mxu0 %v965_v13 }
  0x7a   : > { %864 = vmatpush3.bf16.msra.mxu1 %v982_v37  ;;  %p1096_p12 = por %p1095_p9, %p1094_p5 }
  0x7b   : > { %865 = vmatprep.subr.bf16.mxu1 %v983_v38 }
  0x7c   : > { %471 = vmatpush1.bf16.msra.mxu0 %v967_v14  ;;  %p1097_p2 = pnand %p1096_p12, %p1090_p3 }
  0x7d   : > { %472 = vmatprep.subr.bf16.mxu0 %v968_v15 }
  0x7e   : > { %866 = vmatpush3.bf16.msra.mxu1 %v984_v39 }
  0x7f   : > { %867 = vmatprep.subr.bf16.mxu1 %v985_v40 }
  0x80   : > { %473 = vmatpush1.bf16.msra.mxu0 %v970_v17 }
  0x81   : > { %474 = vmatprep.subr.bf16.mxu0 %v971_v18 }
  0x82   : > { %868 = vmatpush3.bf16.msra.mxu1 %v986_v41 }
  0x83   : > { %869 = vmatprep.subr.bf16.mxu1 %v987_v42 }
  0x84   : > { %475 = vmatpush1.bf16.msra.mxu0 %v973_v19 }
  0x85   : > { %476 = vmatprep.subr.bf16.mxu0 %v974_v20 }
  0x86   : > { %870 = vmatpush3.bf16.msra.mxu1 %v988_v43 }
  0x87   : > { %871 = vmatprep.subr.bf16.mxu1 %v989_v44 }
  0x88   : > { %477 = vmatpush1.bf16.msra.mxu0 %v976_v21 }
  0x8a   : > { %872 = vmatpush3.bf16.msra.mxu1 %v990_v45 }
  0x8b   : > { %873 = vmatprep.subr.bf16.mxu1 %v991_v46 }
  0x8e   : > { %874 = vmatpush3.bf16.msra.mxu1 %v992_v47 }
  0xf8   : > { %v328_v6 = vpop.xlane.xlu0 %327 }
  0xf9   : > { %v330_v7 = vmul.f32 0.0078125, %v328_v6 }
  0xfb   : > { %v331_v8 = vsub.f32 %v1391_v0, %v330_v7 }
  0xfd   : > { %v332_v9 = vmul.f32 %v331_v8, %v331_v8 }
  0xff   : > { %333 = vadd.xlane.f32.xlu0 %v332_v9 }
 0x18c   : > { %v334_v26 = vpop.xlane.xlu0 %333 }
 0x18d   : > { %v335_v27 = vmul.f32 0.0078125, %v334_v26 }
 0x18f   : > { %v336_v28 = vadd.f32 1e-06, %v335_v27 }
 0x191   : > { %993 = vrsqrt.f32 %v336_v28 }
 0x19b   : > { %v994_v29 = vpop.eup %993 }
 0x19c   : > { %v338_v31 = vmul.f32 %v994_v29, %v331_v8 }
 0x19e   : > { %v345_v33 = vmul.f32 %v1398_v30, %v338_v31 }
 0x1a0   : > { %v352_v34 = vadd.f32 %v1403_v32, %v345_v33 }
 0x1a2   : > { %v353_v35 = vpack.c.bf16 %v352_v34, %v352_v34 }
 0x1a4   : > { %495 = vmatmul.mubr.bf16.vlgmr.msra.gmra.mrb[0].mxu0 %v353_v35 }
 0x277   : > { %v496_v55 = vpop.f32.mrb[0].mxu0 }
 0x278   : > { %v497_v56 = vadd.f32 %v496_v55, %v375_v53  ;;  %v498_v57 = vpop.f32.mrb[1].mxu0 }
 0x279   : > { %v499_v58 = vadd.f32 %v498_v57, %v379_v54  ;;  %v500_v59 = vpop.f32.mrb[2].mxu0 }
 0x27a   : > { %v505_v60 = vmul.f32 0.70710677, %v497_v56  ;;  %v501_v61 = vpop.f32.mrb[3].mxu0  ;;  %v503_v2 = vmul.f32 0.5, %v497_v56 }
 0x27b   : > { %v506_v62 = vmul.f32 0.70710677, %v499_v58  ;;  %v504_v4 = vmul.f32 0.5, %v499_v58 }
 0x27c   : > { %995 = verf.f32 %v505_v60 }
 0x27d   : > { %997 = verf.f32 %v506_v62 }
 0x286   : > { %v996_v63 = vpop.eup %995 }
 0x287   : > { %v998_v1 = vpop.eup %997  ;;  %v509_v3 = vadd.f32 1.0, %v996_v63 }
 0x288   : > { %v510_v5 = vadd.f32 1.0, %v998_v1 }
 0x289   : > { %v511_v6 = vmul.f32 %v509_v3, %v503_v2 }
 0x28a   : > { %v512_v7 = vmul.f32 %v510_v5, %v504_v4 }
 0x28b   : > { %v513_v9 = vpack.c.bf16 %v511_v6, %v511_v6 }
 0x28c   : > { %v514_v8 = vpack.c.bf16 %v512_v7, %v512_v7 }
 0x28e   : > { %682 = vmatprep.mubr.bf16.mxu1 %v514_v8 }
 0x28f   : > { %683 = vmatmul.mubr.bf16.vlgmr.msra.gmra.mrb[0].mxu1 %v513_v9 }
 0x362   : > { %v875_v10 = vpop.f32.mrb[0].mxu1 }
 0x363   : > { %v876_v12 = vpop.f32.mrb[1].mxu1 }
 0x364   : > { %v877_v13 = vadd.f32 %v876_v12, %v875_v10  ;;  %v878_v14 = vpop.f32.mrb[2].mxu1 }
 0x365   : > { %v879_v15 = vpop.f32.mrb[3].mxu1 }
 0x366   : > { %v685_v16 = vadd.f32 %v877_v13, %v838_v11 }
 0x368   : > { %v690_v17 = vadd.f32 %v685_v16, %v1391_v0 }
 0x36a   : > { %691 = vadd.xlane.f32.xlu1 %v690_v17 }
 0x3f7   : > { %v692_v18 = vpop.xlane.xlu1 %691 }
 0x3f8   : > { %v693_v19 = vmul.f32 0.0078125, %v692_v18 }
 0x3fa   : > { %v694_v20 = vsub.f32 %v690_v17, %v693_v19 }
 0x3fc   : > { %v695_v21 = vmul.f32 %v694_v20, %v694_v20 }
 0x3fe   : > { %696 = vadd.xlane.f32.xlu1 %v695_v21 }
 0x48b   : > { %v697_v22 = vpop.xlane.xlu1 %696 }
 0x48c   : > { %v698_v23 = vmul.f32 0.0078125, %v697_v22 }
 0x48e   : > { %v699_v24 = vadd.f32 1e-06, %v698_v23 }
 0x490   : > { %999 = vrsqrt.f32 %v699_v24 }
 0x49a   : > { %v1000_v25 = vpop.eup %999 }
 0x49b   : > { %v701_v26 = vmul.f32 %v1000_v25, %v694_v20 }
 0x49d   : > { %v702_v0 = vmul.f32 %v1398_v30, %v701_v26 }
 0x49f   : > { %v703_v27 = vadd.f32 %v1403_v32, %v702_v0 }
 0x4a1   : > { %704 = vst [vmem:[%s322_s19] sm:$0xff] %v703_v27 }
 0x4a2   : > { %1100 = shalt.err (!%p1097_p2)
}
 0x4a3   : > { %s1101_s15 = scalar_lea.hbm %s1422_s9, 128  ;;  %s1105_s22 = scalar_lea.hbm %s1473_s7, 256 }
 0x4a4   : > { %p1102_p13 = scmp.ne.s32.totalorder %s1422_s9, %s1101_s15  ;;  %p1106_p4 = scmp.lt.u32.totalorder %s1422_s9, %s1473_s7 }
 0x4a5   : > { %p1107_p7 = scmp.lt.u32.totalorder %s1105_s22, %s1101_s15  ;;  %p1109_p11 = scmp.lt.u32.totalorder %s1101_s15, %s1422_s9 }
 0x4a6   : > { %p1103_p6 = pnand %p1102_p13, %p1487_p0 }
 0x4a7   : > { %p1108_p8 = por %p1107_p7, %p1106_p4 }
 0x4a8   : > { %p1104_p10 = pneg %p1103_p6 }
 0x4a9   : > { %p1110_p1 = por %p1109_p11, %p1108_p8 }
 0x4ab   : > { %p1111_p3 = pnand %p1110_p1, %p1104_p10 }
 0x4ad   : > { %1114 = shalt.err (!%p1111_p3)
}
 0x4ae   : > { %891 = dma.vmem_to_hbm [thread:$0]  (%p1487_p0), %s1424_s20, 128, %s1422_s9, %s706_s11  }
 0x4af PF: > { %s731_s21 = sand.u32 1, %s1145_s24   ;;  %p1488_p5 = scmp.ne.s32.totalorder %s1478_s8, 0 }
 0x4b0   : > { %p1489_p9 = scmp.ge.s32.totalorder %s1157_s27, 2  ;;  %s732_s30 = scalar_lea.sflag [#allocation4], %s731_s21 }
 0x4b2   : > { %p905_p12 = pnand %p1489_p9, %p1488_p5 }
 0x4b4   : > { %1140 = dma.done.wait (!%p905_p12), %s732_s30, 128  }
 0x4b5   : > { %1142 = vsyncadd (!%p905_p12), %s732_s30, 4294967168  ;;  %p21_p2 = scmp.ge.s32.totalorder %s1318_s13, 4   ;;  %s1490_s24 = smov %s1149_s25 }
 0x4b6   : > { %s1491_s25 = smov %s1153_s26  ;;  %s1492_s26 = smov %s1327_s17 }
 0x4b7   : > { %s1493_s27 = smov %s1318_s13  ;;  %23 = sbr.rel (!%p21_p2) target bundleno = 6 (0x6), region = 101 }
 0x4be   :  { %737 = vsyncpa [#allocation3], 1 }
 0x4bf   :  { %739 = vsyncpa [#allocation3 + $0x1], 1 }
 0x4c0   :  { %740 = vsyncpa [#allocation6], 1 }
 0x4c1   :  { %741 = vsyncpa [#allocation4], 1 }
 0x4c2   :  { %743 = vsyncpa [#allocation4 + $0x1], 1 }

</bundles_post_ra>
